<compile_context>
chip_gen: v7x
topology: tpu7x:2x2x1
jax: 0.10.0
libtpu: 0.0.40
codegen_flags: <defaults>
</compile_context>

<pallas_src>
import jax
import jax.numpy as jnp
from jax.experimental import pallas as pl
from jax.experimental.pallas import tpu as pltpu


def _copy_kernel(x_ref, o_ref):
    o_ref[...] = x_ref[...]


def _lane_dense_2d(total: int):
    """Pick (rows, cols) with rows * cols == total and cols a large multiple of 128."""
    if total % 128 == 0:
        cols = 128
        while cols * 2 <= 16384 and total % (cols * 2) == 0:
            cols *= 2
        return total // cols, cols
    # Fallback: a single full-extent row (block == full array dims is legal).
    return 1, total


def _pallas_identity_copy(x: jax.Array) -> jax.Array:
    """Materialize a copy of `x` with a tiled, lane-dense Pallas copy kernel."""
    orig_shape = x.shape
    total = 1
    for d in orig_shape:
        total *= d
    rows, cols = _lane_dense_2d(total)
    x2d = x.reshape(rows, cols)

    # ~4 MiB row tiles, sublane(8)-aligned; double-buffered in+out stays well
    # under the 32 MiB scoped-VMEM limit on all generations.
    bytes_per_row = cols * x.dtype.itemsize
    target_bytes = 4 * 1024 * 1024
    t_rows = max(1, target_bytes // bytes_per_row)
    if t_rows >= rows:
        t_rows = rows  # full extent — always a legal block shape
    else:
        t_rows = max(8, (t_rows // 8) * 8)

    grid = (pl.cdiv(rows, t_rows),)

    out2d = pl.pallas_call(
        _copy_kernel,
        out_shape=jax.ShapeDtypeStruct((rows, cols), x.dtype),
        grid=grid,
        in_specs=[pl.BlockSpec((t_rows, cols), lambda i: (i, 0))],
        out_specs=pl.BlockSpec((t_rows, cols), lambda i: (i, 0)),
        input_output_aliases={0: 0},
        compiler_params=pltpu.CompilerParams(
            dimension_semantics=("parallel",),
            vmem_limit_bytes=32 * 1024 * 1024,
        ),
    )(x2d)
    return out2d.reshape(orig_shape)


def last_hidden_state_only(last_hidden_state: jax.Array,
                           attention_mask=None,
                           *,
                           materialize_copy: bool = False) -> jax.Array:
    """Pallas equivalent of LastHiddenStateOnly.forward.

    Args:
      last_hidden_state: [B, S, H] array (x.last_hidden_state).
      attention_mask:    [B, S] array; intentionally ignored (API parity with
                         the PyTorch module).
      materialize_copy:  if True, run the Pallas copy kernel instead of the
                         zero-cost identity pass-through.

    Returns:
      [B, S, H] array identical to `last_hidden_state`.
    """
    del attention_mask  # unused, matching the PyTorch module
    if not materialize_copy:
        # Preferred path: the module is a pure identity — no kernel, no HBM
        # round-trip.
        return last_hidden_state
    return _pallas_identity_copy(last_hidden_state)


if __name__ == "__main__":
    # Module has no parameters (__init__ defines nothing), so nothing to init.
    key = jax.random.PRNGKey(0)
    k_x, k_m = jax.random.split(key)

    B, S, H = 2, 8, 32
    last_hidden_state = jax.random.normal(k_x, (B, S, H), dtype=jnp.float32)
    attention_mask = (jax.random.uniform(k_m, (B, S)) > 0.3).astype(jnp.int32)

    # Default (optimized) path: identity pass-through.
    out_fast = last_hidden_state_only(last_hidden_state, attention_mask)

    # Pallas kernel path: materialized copy (run once, as required).
    out_kernel = last_hidden_state_only(
        last_hidden_state, attention_mask, materialize_copy=True)
    out_kernel = jax.block_until_ready(out_kernel)

    assert out_fast.shape == (B, S, H)
    assert out_kernel.shape == (B, S, H)
    assert out_kernel.dtype == last_hidden_state.dtype
    assert bool(jnp.array_equal(out_fast, last_hidden_state))
    assert bool(jnp.array_equal(out_kernel, last_hidden_state))
    print("KERNEL_OK")
</pallas_src>

<mosaic_0001>
module attributes {stable_mosaic.version = 11 : i64} {
  func.func @_copy_kernel(%arg0: i32, %arg1: memref<1x512xf32, #tpu.memory_space<vmem>>, %arg2: memref<1x512xf32, #tpu.memory_space<vmem>>) attributes {dimension_semantics = [#tpu.dimension_semantics<parallel>], iteration_bounds = array<i64: 1>, scalar_prefetch = 0 : i64, scratch_operands = 0 : i64, tpu.core_type = #tpu.core_type<tc>, window_params = [{transform_indices = @transform_0, window_bounds = array<i64: 1, 512>}, {transform_indices = @transform_1, window_bounds = array<i64: 1, 512>}]} {
    %c0 = arith.constant 0 : index
    %c0_0 = arith.constant 0 : index
    %0 = vector.load %arg1[%c0, %c0_0] : memref<1x512xf32, #tpu.memory_space<vmem>>, vector<1x512xf32>
    %c0_1 = arith.constant 0 : index
    %c0_2 = arith.constant 0 : index
    %1 = vector.load %arg2[%c0_1, %c0_2] : memref<1x512xf32, #tpu.memory_space<vmem>>, vector<1x512xf32>
    tpu.vector_store %arg2[%c0_1, %c0_2], %0 {strides = array<i32>} : memref<1x512xf32, #tpu.memory_space<vmem>>, vector<1x512xf32>,
    return
  }
  func.func @transform_0(%arg0: i32) -> (i32, i32) {
    %c0_i32 = arith.constant 0 : i32
    %c0_i32_0 = arith.constant 0 : i32
    return %arg0, %c0_i32 : i32, i32
  }
  func.func @transform_1(%arg0: i32) -> (i32, i32) {
    %c0_i32 = arith.constant 0 : i32
    %c0_i32_0 = arith.constant 0 : i32
    return %arg0, %c0_i32 : i32, i32
  }
}

</mosaic_0001>

<bundles_post_ra>
// kernel: tpu_custom_call.1
= control target key start
LH: loop header
LB: loop body
LE: loop exit
PB: predicated region body
PF: predicated region fallthrough
CT: control target
= control target key end

     0   :  { %6 = vsyncpa [#allocation3], 0  ;;  %s128_s0 = inlined_call_operand.hbm [shape: f32[1,512], index: 0, kind: input, shape index: {}, may-alias: {0,1}]   ;;  %s129_s1 = inlined_call_operand.hbm [shape: f32[1,512], index: 1, kind: output, shape index: {}, may-alias: {0,1}]  }
   0x1   :  { %7 = vsyncpa [#allocation4], 0  ;;  %s92_s6 = smov [#allocation2]   ;;  %s44_s10 = scalar_lea.hbm %s128_s0, 64 }
   0x2   :  { %s14_s7 = sshll.u32 %s92_s6, 4  ;;  %p45_p0 = scmp.ne.s32.totalorder %s128_s0, %s44_s10  ;;  %s15_s7 = int_to_ptr.vmem [resolvable:$true] %s14_s7 }
   0x3   :  { %p48_p1 = scmp.lt.u32.totalorder %s44_s10, %s128_s0 }
   0x5   :  { %p50_p2 = pnand %p48_p1, %p45_p0 }
   0x7   :  { %53 = shalt.err (!%p50_p2)
}
   0x8   :  { %s54_s15 = scalar_lea.vmem %s15_s7, 64  ;;  %p59_p4 = scmp.lt.s32.totalorder %s15_s7, %s15_s7 }
   0x9   :  { %p55_p3 = scmp.ne.s32.totalorder %s15_s7, %s54_s15  ;;  %p60_p5 = scmp.lt.s32.totalorder %s54_s15, %s54_s15 }
   0xb   :  { %p61_p6 = por %p60_p5, %p59_p4 }
   0xd   :  { %p62_p7 = pnand %p61_p6, %p55_p3 }
   0xf   :  { %65 = shalt.err (!%p62_p7)
}
  0x10   :  { %17 = dma.hbm_to_vmem [thread:$0]  %s128_s0, 64, %s15_s7, [#allocation3]  }
  0x11   :  { %88 = dma.done.wait [#allocation3], 64  }
  0x12   :  { %89 = vsyncadd [#allocation3], 4294967232  ;;  %v22_v0 = vlaneseq  ;;  %s93_s18 = smov [#allocation5]   ;;  %v21_v1 = vld [vmem:[#allocation2] sm:$0xf] }
  0x13   :  { %s33_s19 = sshll.u32 %s93_s18, 4  ;;  %s34_s19 = int_to_ptr.vmem [resolvable:$true] %s33_s19 }
  0x14   :  { %vm24_vm0 = vcmp.lt.s32.totalorder %v22_v0, 512  ;;  %s66_s20 = scalar_lea.vmem %s34_s19, 64  ;;  %p71_p9 = scmp.lt.s32.totalorder %s34_s19, %s34_s19 }
  0x15   :  { %26 = vst.msk [vmem:[#allocation5] sm:$0xf] %vm24_vm0, %v21_v1  ;;  %p67_p8 = scmp.ne.s32.totalorder %s34_s19, %s66_s20  ;;  %p72_p10 = scmp.lt.s32.totalorder %s66_s20, %s66_s20 }
  0x17   :  { %p73_p11 = por %p72_p10, %p71_p9 }
  0x19   :  { %p74_p12 = pnand %p73_p11, %p67_p8 }
  0x1b   :  { %77 = shalt.err (!%p74_p12)
}
  0x1c   :  { %s78_s0 = scalar_lea.hbm %s129_s1, 64 }
  0x1d   :  { %p79_p13 = scmp.ne.s32.totalorder %s129_s1, %s78_s0  ;;  %p82_p0 = scmp.lt.u32.totalorder %s78_s0, %s129_s1 }
  0x1f   :  { %p84_p1 = pnand %p82_p0, %p79_p13 }
  0x21   :  { %87 = shalt.err (!%p84_p1)
}
  0x22   :  { %36 = dma.vmem_to_hbm [thread:$0]  %s34_s19, 64, %s129_s1, [#allocation4]  }
  0x23   :  { %90 = dma.done.wait [#allocation4], 64  }
  0x24   :  { %91 = vsyncadd [#allocation4], 4294967232 }
  0x25   :  { %40 = vsyncpa [#allocation3], 1 }
  0x26   :  { %41 = vsyncpa [#allocation4], 1 }

</bundles_post_ra>
